<compile_context>
chip_gen: v7x
topology: tpu7x:2x2x1
jax: 0.10.0
libtpu: 0.0.40
codegen_flags: <defaults>
</compile_context>

<pallas_src>
import functools

import jax
import jax.numpy as jnp
from jax.experimental import pallas as pl
from jax.experimental.pallas import tpu as pltpu

EPS = 1e-5

# Conservative VMEM numbers that hold on every generation (v5e/v6e scoped
# default 16/32 MiB; v7x 64 MiB physical).  We raise the scoped limit to
# 48 MiB and keep our own pipelined-buffer budgets well below it.
_VMEM_LIMIT_BYTES = 48 * 1024 * 1024
_FUSED_BUDGET_BYTES = 32 * 1024 * 1024     # gate for the single-pass path
_BLOCK_BUDGET_BYTES = 4 * 1024 * 1024      # per-block target, two-pass path
_BLOCK_HARD_CAP_BYTES = 8 * 1024 * 1024    # full-extent fallback guard


def _largest_divisor_leq(n, cap):
    cap = max(1, min(n, cap))
    for d in range(cap, 0, -1):
        if n % d == 0:
            return d
    return 1


def _sublane_pack(itemsize):
    # rows packed per sublane: 8 for 4-byte, 16 for 2-byte, 32 for 1-byte
    return max(8, 32 // max(1, int(itemsize)))


# --------------------------------------------------------------------------
# Single-pass kernel: one channel stripe (N, Cb, L) resident in VMEM.
# --------------------------------------------------------------------------
def _fused_kernel(x_ref, gamma_ref, beta_ref, o_ref, *, total_count):
    x = x_ref[...].astype(jnp.float32)                      # (N, Cb, L)
    inv_n = 1.0 / total_count
    # reduce over N first (VALU vreg adds), then one cross-lane reduce (XLU)
    s_nl = jnp.sum(x, axis=0)                               # (Cb, L)
    mean = jnp.sum(s_nl, axis=1, keepdims=True) * inv_n     # (Cb, 1)
    xc = x - mean[None]
    m2_nl = jnp.sum(xc * xc, axis=0)                        # (Cb, L)
    var = jnp.sum(m2_nl, axis=1, keepdims=True) * inv_n     # (Cb, 1), biased
    inv_std = jax.lax.rsqrt(var + EPS)
    scale = gamma_ref[...] * inv_std
    shift = beta_ref[...] - mean * scale
    o_ref[...] = (x * scale[None] + shift[None]).astype(o_ref.dtype)


# --------------------------------------------------------------------------
# Two-pass kernels (streaming, for activations too big to keep resident).
# --------------------------------------------------------------------------
def _stats_kernel(x_ref, gamma_ref, beta_ref, scale_ref, shift_ref,
                  mean_acc, m2_acc, *, total_count):
    """Pass 1: per-channel mean / M2 accumulation, finalize folded affine."""
    ni = pl.program_id(1)
    li = pl.program_id(2)
    n_li = pl.num_programs(2)
    is_first = jnp.logical_and(ni == 0, li == 0)
    is_last = jnp.logical_and(ni == pl.num_programs(1) - 1, li == n_li - 1)

    @pl.when(is_first)
    def _():
        mean_acc[...] = jnp.zeros_like(mean_acc)
        m2_acc[...] = jnp.zeros_like(m2_acc)

    x = x_ref[...].astype(jnp.float32)                      # (Nb, Cb, Lb)
    nb_count = x.shape[0] * x.shape[2]                      # static tile count
    inv_nb = 1.0 / nb_count

    # reduce over N first (VALU), single cross-lane reduce at the end (XLU)
    s_nl = jnp.sum(x, axis=0)                               # (Cb, Lb)
    tile_sum = jnp.sum(s_nl, axis=1, keepdims=True)         # (Cb, 1)
    tile_mean = tile_sum * inv_nb
    xc = x - tile_mean[None]
    m2_nl = jnp.sum(xc * xc, axis=0)                        # (Cb, Lb)
    tile_m2 = jnp.sum(m2_nl, axis=1, keepdims=True)         # (Cb, 1)

    # Chan / Welford parallel combine; element count tracked in f32 so very
    # large N*L cannot overflow int32.
    step = ni * n_li + li
    na = step.astype(jnp.float32) * float(nb_count)
    nb_f = float(nb_count)
    n_new = na + nb_f
    delta = tile_mean - mean_acc[...]
    mean_acc[...] = mean_acc[...] + delta * (nb_f / n_new)
    m2_acc[...] = m2_acc[...] + tile_m2 + (delta * delta) * (na * (nb_f / n_new))

    @pl.when(is_last)
    def _():
        var = m2_acc[...] * (1.0 / total_count)             # biased variance
        inv_std = jax.lax.rsqrt(var + EPS)
        scale = gamma_ref[...] * inv_std
        scale_ref[...] = scale
        shift_ref[...] = beta_ref[...] - mean_acc[...] * scale


def _norm_kernel(x_ref, scale_ref, shift_ref, o_ref):
    """Pass 2: y = x * scale + shift (per-channel folded affine)."""
    x = x_ref[...].astype(jnp.float32)                      # (Nb, Cb, Lb)
    y = x * scale_ref[...][None] + shift_ref[...][None]
    o_ref[...] = y.astype(o_ref.dtype)


# --------------------------------------------------------------------------
# Wrapper
# --------------------------------------------------------------------------
def tensor_batchnorm(x, gamma, beta, num_features, *, _force_two_pass=False):
    """x: arbitrary-rank array with shape[1] == num_features (e.g. NCHW)."""
    orig_shape = x.shape
    n = orig_shape[0]
    c = num_features
    x3 = x.reshape(n, c, -1)                                # (N, C, L), no transpose
    l = x3.shape[2]
    itemsize = int(jnp.dtype(x.dtype).itemsize)
    sub = _sublane_pack(itemsize)

    gamma2 = gamma.reshape(c, 1).astype(jnp.float32)
    beta2 = beta.reshape(c, 1).astype(jnp.float32)

    # legal channel-stripe size (second-to-last block dim must be a multiple
    # of 8 or the full extent; prefer the dtype-aware sublane pack)
    if c % sub == 0:
        cb_base = sub
    elif c % 8 == 0:
        cb_base = 8
    else:
        cb_base = c                                         # full extent is legal

    # -------- single-pass VMEM-resident fast path ---------------------------
    # per-stripe need ~= double-buffered in+out blocks + f32 temporaries
    fused_need = n * cb_base * l * (4 * itemsize + 16)
    if (not _force_two_pass) and fused_need <= _FUSED_BUDGET_BYTES:
        kernel = functools.partial(_fused_kernel, total_count=float(n * l))
        x_spec = pl.BlockSpec((n, cb_base, l), lambda ci: (0, ci, 0))
        vec_spec = pl.BlockSpec((cb_base, 1), lambda ci: (ci, 0))
        y3 = pl.pallas_call(
            kernel,
            out_shape=jax.ShapeDtypeStruct((n, c, l), x.dtype),
            grid_spec=pltpu.PrefetchScalarGridSpec(
                num_scalar_prefetch=0,
                grid=(c // cb_base,),
                in_specs=[x_spec, vec_spec, vec_spec],
                out_specs=x_spec,
            ),
            compiler_params=pltpu.CompilerParams(
                dimension_semantics=("parallel",),
                vmem_limit_bytes=_VMEM_LIMIT_BYTES),
        )(x3, gamma2, beta2)
        return y3.reshape(orig_shape)

    # -------- two-pass streaming path ---------------------------------------
    # tile selection: byte-based, dtype-aware, lane dim gets the budget first
    c_pad = c
    cb = cb_base

    if l % 128 == 0:
        lane_cap = max(1, _BLOCK_BUDGET_BYTES // (cb * 128 * itemsize))
        lb = 128 * _largest_divisor_leq(l // 128, min(lane_cap, 64))  # <= 8192
    else:
        lb = l                                              # full-extent fallback

    cap_n = max(1, _BLOCK_BUDGET_BYTES // (cb * lb * itemsize))
    nb = _largest_divisor_leq(n, cap_n)

    # guard full-extent fallbacks so blocks never blow scoped/physical VMEM
    if nb * cb * lb * itemsize > _BLOCK_HARD_CAP_BYTES:
        nb = 1
    if nb * cb * lb * itemsize > _BLOCK_HARD_CAP_BYTES and cb == c and c % 8 != 0:
        # pad channels up to a multiple of 8; per-channel stats are independent
        # and padded channels are sliced off below, so results are unchanged
        c_pad = ((c + 7) // 8) * 8
        x3 = jnp.pad(x3, ((0, 0), (0, c_pad - c), (0, 0)))
        gamma2 = jnp.pad(gamma2, ((0, c_pad - c), (0, 0)), constant_values=1.0)
        beta2 = jnp.pad(beta2, ((0, c_pad - c), (0, 0)))
        cb = 8
    # TODO(synk): if L is both huge and not a multiple of 128 the (nb, cb, L)
    # block can still be large on v7x; a masked/padded-L stats pass would be
    # needed for that corner case.

    grid = (c_pad // cb, n // nb, l // lb)

    x_spec = pl.BlockSpec((nb, cb, lb), lambda ci, ni, li: (ni, ci, li))
    vec_spec = pl.BlockSpec((cb, 1), lambda ci, ni, li: (ci, 0))

    # ---- pass 1: per-channel stats -> folded scale/shift -------------------
    stats_kernel = functools.partial(_stats_kernel, total_count=float(n * l))
    scale, shift = pl.pallas_call(
        stats_kernel,
        out_shape=(jax.ShapeDtypeStruct((c_pad, 1), jnp.float32),
                   jax.ShapeDtypeStruct((c_pad, 1), jnp.float32)),
        grid_spec=pltpu.PrefetchScalarGridSpec(
            num_scalar_prefetch=0,
            grid=grid,
            in_specs=[x_spec, vec_spec, vec_spec],
            out_specs=[vec_spec, vec_spec],
            scratch_shapes=[pltpu.VMEM((cb, 1), jnp.float32),
                            pltpu.VMEM((cb, 1), jnp.float32)],
        ),
        compiler_params=pltpu.CompilerParams(
            dimension_semantics=("parallel", "arbitrary", "arbitrary"),
            vmem_limit_bytes=_VMEM_LIMIT_BYTES),
    )(x3, gamma2, beta2)

    # ---- pass 2: normalize (streaming, fully parallel grid) ----------------
    y3 = pl.pallas_call(
        _norm_kernel,
        out_shape=jax.ShapeDtypeStruct((n, c_pad, l), x.dtype),
        grid_spec=pltpu.PrefetchScalarGridSpec(
            num_scalar_prefetch=0,
            grid=grid,
            in_specs=[x_spec, vec_spec, vec_spec],
            out_specs=x_spec,
        ),
        compiler_params=pltpu.CompilerParams(
            dimension_semantics=("parallel", "parallel", "parallel"),
            vmem_limit_bytes=_VMEM_LIMIT_BYTES),
    )(x3, scale, shift)

    if c_pad != c:
        y3 = y3[:, :c, :]
    return y3.reshape(orig_shape)
    # TODO(synk): running_mean / running_var buffer updates (training-time
    # side-effect state of nn.BatchNorm1d) are not materialized; the returned
    # tensor matches the module's forward output.


def _reference(x, gamma, beta, num_features):
    orig_shape = x.shape
    x3 = x.reshape(orig_shape[0], num_features, -1).astype(jnp.float32)
    mean = jnp.mean(x3, axis=(0, 2), keepdims=True)
    var = jnp.mean((x3 - mean) ** 2, axis=(0, 2), keepdims=True)
    y = (x3 - mean) / jnp.sqrt(var + EPS)
    y = y * gamma.reshape(1, -1, 1) + beta.reshape(1, -1, 1)
    return y.reshape(orig_shape)


if __name__ == "__main__":
    key = jax.random.PRNGKey(0)
    N, C, H, W = 2, 4, 16, 16
    x = jax.random.normal(key, (N, C, H, W), dtype=jnp.float32)

    # BatchNorm1d default affine params: weight=1, bias=0 (deterministic)
    gamma = jnp.ones((C,), dtype=jnp.float32)
    beta = jnp.zeros((C,), dtype=jnp.float32)

    # fast (single-pass, VMEM-resident) path
    y_fused = jax.block_until_ready(tensor_batchnorm(x, gamma, beta, C))
    # also exercise the two-pass streaming path used for large activations
    y_2pass = jax.block_until_ready(
        tensor_batchnorm(x, gamma, beta, C, _force_two_pass=True))

    y_ref = _reference(x, gamma, beta, C)
    assert y_fused.shape == x.shape
    assert jnp.max(jnp.abs(y_fused - y_ref)) < 1e-4
    assert jnp.max(jnp.abs(y_2pass - y_ref)) < 1e-4

    print("KERNEL_OK")
</pallas_src>

<mosaic_0001>
module attributes {stable_mosaic.version = 11 : i64} {
  func.func @_fused_kernel(%arg0: i32, %arg1: memref<2x4x256xf32, #tpu.memory_space<vmem>>, %arg2: memref<4x1xf32, #tpu.memory_space<vmem>>, %arg3: memref<4x1xf32, #tpu.memory_space<vmem>>, %arg4: memref<2x4x256xf32, #tpu.memory_space<vmem>>) attributes {dimension_semantics = [#tpu.dimension_semantics<parallel>], iteration_bounds = array<i64: 1>, scalar_prefetch = 0 : i64, scratch_operands = 0 : i64, tpu.core_type = #tpu.core_type<tc>, window_params = [{transform_indices = @transform_0, window_bounds = array<i64: 2, 4, 256>}, {transform_indices = @transform_1, window_bounds = array<i64: 4, 1>}, {transform_indices = @transform_2, window_bounds = array<i64: 4, 1>}, {transform_indices = @transform_3, window_bounds = array<i64: 2, 4, 256>}]} {
    %c0 = arith.constant 0 : index
    %c0_0 = arith.constant 0 : index
    %c0_1 = arith.constant 0 : index
    %0 = vector.load %arg1[%c0, %c0_0, %c0_1] : memref<2x4x256xf32, #tpu.memory_space<vmem>>, vector<2x4x256xf32>
    %cst = arith.constant dense<0.000000e+00> : vector<4x256xf32>
    %1 = vector.multi_reduction <add>, %0, %cst [0] : vector<2x4x256xf32> to vector<4x256xf32>
    %cst_2 = arith.constant dense<0.000000e+00> : vector<4xf32>
    %2 = vector.multi_reduction <add>, %1, %cst_2 [1] : vector<4x256xf32> to vector<4xf32>
    %3 = vector.shape_cast %2 : vector<4xf32> to vector<4x1xf32>
    %cst_3 = arith.constant 0.001953125 : f32
    %4 = vector.broadcast %cst_3 : f32 to vector<4x1xf32>
    %5 = arith.mulf %3, %4 : vector<4x1xf32>
    %6 = vector.shape_cast %5 : vector<4x1xf32> to vector<1x4x1xf32>
    %7 = vector.broadcast %6 : vector<1x4x1xf32> to vector<2x4x256xf32>
    %8 = arith.subf %0, %7 : vector<2x4x256xf32>
    %9 = arith.mulf %8, %8 : vector<2x4x256xf32>
    %cst_4 = arith.constant dense<0.000000e+00> : vector<4x256xf32>
    %10 = vector.multi_reduction <add>, %9, %cst_4 [0] : vector<2x4x256xf32> to vector<4x256xf32>
    %cst_5 = arith.constant dense<0.000000e+00> : vector<4xf32>
    %11 = vector.multi_reduction <add>, %10, %cst_5 [1] : vector<4x256xf32> to vector<4xf32>
    %12 = vector.shape_cast %11 : vector<4xf32> to vector<4x1xf32>
    %cst_6 = arith.constant 0.001953125 : f32
    %13 = vector.broadcast %cst_6 : f32 to vector<4x1xf32>
    %14 = arith.mulf %12, %13 : vector<4x1xf32>
    %cst_7 = arith.constant 9.99999974E-6 : f32
    %15 = vector.broadcast %cst_7 : f32 to vector<4x1xf32>
    %16 = arith.addf %14, %15 : vector<4x1xf32>
    %17 = math.rsqrt %16 : vector<4x1xf32>
    %c0_8 = arith.constant 0 : index
    %c0_9 = arith.constant 0 : index
    %18 = vector.load %arg2[%c0_8, %c0_9] : memref<4x1xf32, #tpu.memory_space<vmem>>, vector<4x1xf32>
    %19 = arith.mulf %18, %17 : vector<4x1xf32>
    %c0_10 = arith.constant 0 : index
    %c0_11 = arith.constant 0 : index
    %20 = vector.load %arg3[%c0_10, %c0_11] : memref<4x1xf32, #tpu.memory_space<vmem>>, vector<4x1xf32>
    %21 = arith.mulf %5, %19 : vector<4x1xf32>
    %22 = arith.subf %20, %21 : vector<4x1xf32>
    %23 = vector.shape_cast %19 : vector<4x1xf32> to vector<1x4x1xf32>
    %24 = vector.broadcast %23 : vector<1x4x1xf32> to vector<2x4x256xf32>
    %25 = arith.mulf %0, %24 : vector<2x4x256xf32>
    %26 = vector.shape_cast %22 : vector<4x1xf32> to vector<1x4x1xf32>
    %27 = vector.broadcast %26 : vector<1x4x1xf32> to vector<2x4x256xf32>
    %28 = arith.addf %25, %27 : vector<2x4x256xf32>
    %c0_12 = arith.constant 0 : index
    %c0_13 = arith.constant 0 : index
    %c0_14 = arith.constant 0 : index
    %29 = vector.load %arg4[%c0_12, %c0_13, %c0_14] : memref<2x4x256xf32, #tpu.memory_space<vmem>>, vector<2x4x256xf32>
    tpu.vector_store %arg4[%c0_12, %c0_13, %c0_14], %28 {strides = array<i32>} : memref<2x4x256xf32, #tpu.memory_space<vmem>>, vector<2x4x256xf32>,
    return
  }
  func.func @transform_0(%arg0: i32) -> (i32, i32, i32) {
    %c0_i32 = arith.constant 0 : i32
    %c0_i32_0 = arith.constant 0 : i32
    %c0_i32_1 = arith.constant 0 : i32
    return %c0_i32, %arg0, %c0_i32_0 : i32, i32, i32
  }
  func.func @transform_1(%arg0: i32) -> (i32, i32) {
    %c0_i32 = arith.constant 0 : i32
    %c0_i32_0 = arith.constant 0 : i32
    return %arg0, %c0_i32 : i32, i32
  }
  func.func @transform_2(%arg0: i32) -> (i32, i32) {
    %c0_i32 = arith.constant 0 : i32
    %c0_i32_0 = arith.constant 0 : i32
    return %arg0, %c0_i32 : i32, i32
  }
  func.func @transform_3(%arg0: i32) -> (i32, i32, i32) {
    %c0_i32 = arith.constant 0 : i32
    %c0_i32_0 = arith.constant 0 : i32
    %c0_i32_1 = arith.constant 0 : i32
    return %c0_i32, %arg0, %c0_i32_0 : i32, i32, i32
  }
}

</mosaic_0001>

<bundles_post_ra>
// kernel: tpu_custom_call.1
= control target key start
LH: loop header
LB: loop body
LE: loop exit
PB: predicated region body
PF: predicated region fallthrough
CT: control target
= control target key end

     0   :  { %8 = vsyncpa [#allocation3], 0  ;;  %s269_s0 = inlined_call_operand.hbm [shape: f32[2,4,256], index: 0, kind: input, shape index: {}]   ;;  %s270_s1 = inlined_call_operand.vmem [shape: f32[4,1], index: 1, kind: input, shape index: {}]   ;;  %s271_s2 = inlined_call_operand.vmem [shape: f32[4,1], index: 2, kind: input, shape index: {}]   ;;  %s272_s3 = inlined_call_operand.hbm [shape: f32[2,4,256], index: 3, kind: output, shape index: {}]  }
   0x1   :  { %9 = vsyncpa [#allocation4], 0  ;;  %s195_s12 = smov [#allocation2]   ;;  %s147_s16 = scalar_lea.hbm %s269_s0, 256 }
   0x2   :  { %s15_s13 = sshll.u32 %s195_s12, 4  ;;  %p148_p0 = scmp.ne.s32.totalorder %s269_s0, %s147_s16  ;;  %s16_s13 = int_to_ptr.vmem [resolvable:$true] %s15_s13 }
   0x3   :  { %p151_p1 = scmp.lt.u32.totalorder %s147_s16, %s269_s0 }
   0x5   :  { %p153_p2 = pnand %p151_p1, %p148_p0 }
   0x7   :  { %156 = shalt.err (!%p153_p2)
}
   0x8   :  { %s157_s21 = scalar_lea.vmem %s16_s13, 256  ;;  %p162_p4 = scmp.lt.s32.totalorder %s16_s13, %s16_s13 }
   0x9   :  { %p158_p3 = scmp.ne.s32.totalorder %s16_s13, %s157_s21  ;;  %p163_p5 = scmp.lt.s32.totalorder %s157_s21, %s157_s21 }
   0xb   :  { %p164_p6 = por %p163_p5, %p162_p4 }
   0xd   :  { %p165_p7 = pnand %p164_p6, %p158_p3 }
   0xf   :  { %168 = shalt.err (!%p165_p7)
}
  0x10   :  { %s196_s22 = smov 128   ;;  %s197_s23 = smov 8  }
  0x11   :  { %21 = dma.hbm_to_vmem [thread:$0]  %s269_s0, 256, %s16_s13, [#allocation3], %s196_s22, %s196_s22, %s197_s23  }
  0x12   :  { %191 = dma.done.wait [#allocation3], 256  }
  0x13   :  { %192 = vsyncadd [#allocation3], 4294967040  ;;  %vm37_vm0 = vcmask 1043456   ;;  %v29_v0 = vld [vmem:[#allocation2] sm:$0xff]  ;;  %v30_v1 = vld [vmem:[#allocation2 + $0x8] sm:$0xff]  ;;  %v54_v15 = vlaneseq  ;;  %v199_v37 = vmov 0  }
  0x14   :  { %v33_v2 = vcombine.high %v29_v0, %v29_v0  ;;  %v34_v3 = vcombine.high %v30_v1, %v30_v1  ;;  %v38_v4 = vsel %vm37_vm0, %v29_v0, 0.0  ;;  %v39_v5 = vsel %vm37_vm0, %v30_v1, 0.0  ;;  %141 = vset.pattern.permute.xlu1 %v199_v37  ;;  %142 = vset.pattern.permute.xlu0 %v199_v37  ;;  %v83_v41 = vld [vmem:[%s270_s1] sm:$0xf]  ;;  %s200_s29 = smov [#allocation5]  }
  0x15   :  { %v40_v6 = vadd.f32 %v39_v5, %v38_v4  ;;  %v198_v13 = vmov 839922192   ;;  %v55_v17 = vshrl.u32 %v54_v15, 7  ;;  %v85_v44 = vld [vmem:[%s271_s2] sm:$0xf]  ;;  %s123_s30 = sshll.u32 %s200_s29, 4  ;;  %s124_s30 = int_to_ptr.vmem [resolvable:$true] %s123_s30 }
  0x16   :  { %v41_v7 = vsel %vm37_vm0, %v33_v2, 0.0  ;;  %v42_v8 = vsel %vm37_vm0, %v34_v3, 0.0  ;;  %v52_v14 = vunpack.c.l.s4 %v198_v13  ;;  %s169_s1 = scalar_lea.vmem %s124_s30, 256  ;;  %p174_p9 = scmp.lt.s32.totalorder %s124_s30, %s124_s30 }
  0x17   :  { %v43_v9 = vadd.f32 %v42_v8, %v41_v7  ;;  %v44_v10 = vsel %vm37_vm0, %v40_v6, 0.0  ;;  %p170_p8 = scmp.ne.s32.totalorder %s124_s30, %s169_s1  ;;  %p175_p10 = scmp.lt.s32.totalorder %s169_s1, %s169_s1 }
  0x18   :  { %v53_v16 = vunpack.c.0.s8 %v52_v14 }
  0x19   :  { %v45_v11 = vsel %vm37_vm0, %v43_v9, 0.0  ;;  %p176_p11 = por %p175_p10, %p174_p9 }
  0x1a   :  { %v46_v12 = vadd.f32 %v45_v11, %v44_v10  ;;  %v56_v18 = vsub.s32 %v53_v16, %v55_v17 }
  0x1b   :  { %p177_p12 = pnand %p176_p11, %p170_p8 }
  0x1c   :  { %47 = vadd.xlane.f32.xlu0 %v46_v12 }
  0xa9   :  { %v48_v19 = vpop.xlane.xlu0 %47 }
  0xaa   :  { %v49_v20 = vmul.f32 0.001953125, %v48_v19 }
  0xac   :  { %v57_v21 = vrot.slane %v49_v20, %v56_v18 }
  0xae   :  { %v59_v22 = vsub.f32 %v29_v0, %v57_v21  ;;  %v60_v23 = vsub.f32 %v30_v1, %v57_v21 }
  0xb0   :  { %v61_v24 = vmul.f32 %v59_v22, %v59_v22  ;;  %v62_v25 = vmul.f32 %v60_v23, %v60_v23 }
  0xb2   :  { %v65_v26 = vcombine.high %v61_v24, %v61_v24  ;;  %v66_v27 = vcombine.high %v62_v25, %v62_v25  ;;  %v69_v28 = vsel %vm37_vm0, %v61_v24, 0.0  ;;  %v70_v29 = vsel %vm37_vm0, %v62_v25, 0.0 }
  0xb3   :  { %v71_v30 = vadd.f32 %v70_v29, %v69_v28 }
  0xb4   :  { %v72_v31 = vsel %vm37_vm0, %v65_v26, 0.0  ;;  %v73_v32 = vsel %vm37_vm0, %v66_v27, 0.0 }
  0xb5   :  { %v74_v33 = vadd.f32 %v73_v32, %v72_v31  ;;  %v75_v34 = vsel %vm37_vm0, %v71_v30, 0.0 }
  0xb7   :  { %v76_v35 = vsel %vm37_vm0, %v74_v33, 0.0 }
  0xb8   :  { %v77_v36 = vadd.f32 %v76_v35, %v75_v34 }
  0xba   :  { %78 = vadd.xlane.f32.xlu0 %v77_v36 }
 0x147   :  { %v79_v38 = vpop.xlane.xlu0 %78 }
 0x148   :  { %v80_v39 = vmul.f32 0.001953125, %v79_v38 }
 0x14a   :  { %v81_v40 = vadd.f32 1e-05, %v80_v39 }
 0x14c   :  { %145 = vrsqrt.f32 %v81_v40 }
 0x156   :  { %v146_v42 = vpop.eup %145 }
 0x157   :  { %v84_v43 = vmul.f32 %v146_v42, %v83_v41 }
 0x159   :  { %90 = vperm.xlu1 %141, %v84_v43   ;;  %v86_v45 = vmul.f32 %v84_v43, %v49_v20 }
 0x15b   :  { %v87_v46 = vsub.f32 %v85_v44, %v86_v45 }
 0x15d   :  { %104 = vperm.xlu1 %141, %v87_v46  }
 0x1d8   :  { %v91_v47 = vpop.permute.xlu1 %90 }
 0x1d9   :  { %v98_v48 = vrot.slane %v91_v47, %v56_v18 }
 0x1db   :  { %v100_v50 = vmul.f32 %v98_v48, %v29_v0  ;;  %v101_v51 = vmul.f32 %v98_v48, %v30_v1 }
 0x1dc   :  { %v105_v49 = vpop.permute.xlu1 %104 }
 0x1dd   :  { %v112_v52 = vrot.slane %v105_v49, %v56_v18 }
 0x1df   :  { %v114_v53 = vadd.f32 %v112_v52, %v100_v50  ;;  %v115_v54 = vadd.f32 %v112_v52, %v101_v51 }
 0x1e1   :  { %116 = vst [vmem:[#allocation5] sm:$0xff] %v114_v53  ;;  %117 = vst [vmem:[#allocation5 + $0x8] sm:$0xff] %v115_v54 }
 0x1e2   :  { %180 = shalt.err (!%p177_p12)
}
 0x1e3   :  { %s181_s5 = scalar_lea.hbm %s272_s3, 256 }
 0x1e4   :  { %p182_p13 = scmp.ne.s32.totalorder %s272_s3, %s181_s5  ;;  %p185_p0 = scmp.lt.u32.totalorder %s181_s5, %s272_s3 }
 0x1e6   :  { %p187_p1 = pnand %p185_p0, %p182_p13 }
 0x1e8   :  { %190 = shalt.err (!%p187_p1)
}
 0x1e9   :  { %129 = dma.vmem_to_hbm [thread:$0]  %s124_s30, 256, %s272_s3, [#allocation4], %s196_s22, %s196_s22, %s197_s23  }
 0x1ea   :  { %193 = dma.done.wait [#allocation4], 256  }
 0x1eb   :  { %194 = vsyncadd [#allocation4], 4294967040 }
 0x1ec   :  { %133 = vsyncpa [#allocation3], 1 }
 0x1ed   :  { %134 = vsyncpa [#allocation4], 1 }

</bundles_post_ra>
